<compile_context>
chip_gen: v7x
topology: tpu7x:2x2x1
jax: 0.10.0
libtpu: 0.0.40
codegen_flags: <defaults>
</compile_context>

<pallas_src>
import functools

import jax
import jax.numpy as jnp
from jax.experimental import pallas as pl
from jax.experimental.pallas import tpu as pltpu


def _round_up(n, m):
    return ((n + m - 1) // m) * m


# ----------------------------- Pallas kernel --------------------------------
def _nextchar_kernel(ids_ref, w1f_ref, b1_ref, w2_ref, b2_ref, *rest,
                     T, V, training):
    if training:
        mask_ref, o_ref = rest
    else:
        (o_ref,) = rest

    block_b = ids_ref.shape[0]
    Hp = w1f_ref.shape[-1]
    mm_dtype = w1f_ref.dtype

    ids = ids_ref[...]                                           # (block_b, T) int32
    v_iota = jax.lax.broadcasted_iota(jnp.int32, (block_b, V), 1)

    # ---- embedding gather fused into lin1 as T one-hot matmuls (MXU) --------
    #   x_flat @ W1 == sum_t onehot(ids[:, t]) @ (emb @ W1[t*E:(t+1)*E, :])
    acc = jnp.zeros((block_b, Hp), jnp.float32)
    for t in range(T):                                           # T = 8, static unroll
        onehot_t = (ids[:, t:t + 1] == v_iota).astype(mm_dtype)  # (block_b, V)
        acc = acc + jnp.dot(onehot_t, w1f_ref[t],
                            preferred_element_type=jnp.float32)

    # ---- bias + ReLU in f32 --------------------------------------------------
    h = jnp.maximum(acc + b1_ref[...], 0.0)

    # ---- dropout: pure select/scale with a precomputed mask {0, 1/(1-p)} -----
    if training:
        h = h * mask_ref[...]

    # ---- lin2 ----------------------------------------------------------------
    h = h.astype(w2_ref.dtype)
    out = jnp.dot(h, w2_ref[...], preferred_element_type=jnp.float32) + b2_ref[...]
    o_ref[...] = out.astype(o_ref.dtype)


def nextchar_mlp(token_ids, w1f, b1, w2, b2, mask=None, *, block_b=None):
    """Fused NextChar forward on prepared (folded + padded) weights.

    token_ids: (B, T) int32; w1f: (T, vocab, Hp); b1: (1, Hp); w2: (Hp, Vp);
    b2: (1, Vp); mask: optional (B, Hp) f32 dropout mask (training mode).
    Returns (B, Vp) f32 logits (caller slices back to vocab).
    """
    B, T = token_ids.shape
    _, V, Hp = w1f.shape
    _, Vp = w2.shape
    training = mask is not None

    if block_b is None:
        # Whole batch in one step up to 1024 rows (VMEM use is tiny); larger
        # batches tile so grid steps shard across TensorCores ("parallel").
        block_b = B if B <= 1024 else 1024
    assert B % block_b == 0, "batch must be divisible by block_b"
    grid = (B // block_b,)

    kernel = functools.partial(_nextchar_kernel, T=T, V=V, training=training)

    in_specs = [
        pl.BlockSpec((block_b, T), lambda i: (i, 0)),     # token ids (VMEM tile)
        pl.BlockSpec((T, V, Hp),   lambda i: (0, 0, 0)),  # folded emb@W1 table
        pl.BlockSpec((1, Hp),      lambda i: (0, 0)),     # b1 (padded)
        pl.BlockSpec((Hp, Vp),     lambda i: (0, 0)),     # w2 (padded)
        pl.BlockSpec((1, Vp),      lambda i: (0, 0)),     # b2 (padded)
    ]
    args = [token_ids, w1f, b1, w2, b2]
    if training:
        in_specs.append(pl.BlockSpec((block_b, Hp), lambda i: (i, 0)))
        args.append(mask)

    return pl.pallas_call(
        kernel,
        out_shape=jax.ShapeDtypeStruct((B, Vp), jnp.float32),
        grid_spec=pltpu.PrefetchScalarGridSpec(
            num_scalar_prefetch=0,
            grid=grid,
            in_specs=in_specs,
            out_specs=pl.BlockSpec((block_b, Vp), lambda i: (i, 0)),
        ),
        compiler_params=pltpu.CompilerParams(
            dimension_semantics=("parallel",)),
    )(*args)


# ------------------------- params & forward wrapper --------------------------
def init_params(key, block_size, vocab_size, emb_dim, hidden_size):
    """PyTorch-like init; linear weights stored [in_features, out_features]."""
    k_emb, k_w1, k_b1, k_w2, k_b2 = jax.random.split(key, 5)
    din = block_size * emb_dim
    emb = jax.random.normal(k_emb, (vocab_size, emb_dim), jnp.float32)
    lim1 = 1.0 / jnp.sqrt(din)
    w1 = jax.random.uniform(k_w1, (din, hidden_size), jnp.float32, -lim1, lim1)
    b1 = jax.random.uniform(k_b1, (1, hidden_size), jnp.float32, -lim1, lim1)
    lim2 = 1.0 / jnp.sqrt(hidden_size)
    w2 = jax.random.uniform(k_w2, (hidden_size, vocab_size), jnp.float32, -lim2, lim2)
    b2 = jax.random.uniform(k_b2, (1, vocab_size), jnp.float32, -lim2, lim2)
    return {"emb": emb, "w1": w1, "b1": b1, "w2": w2, "b2": b2}


def prepare_params(params, block_size, *, use_bf16=False):
    """One-time layout prep:
      * fold the embedding table into lin1:  w1f[t] = emb @ W1[t*E:(t+1)*E, :]
      * zero-pad hidden / vocab output dims to 128-lane multiples
      * optional bf16 storage for the MXU operands (biases stay f32)."""
    emb, w1, b1, w2, b2 = (params["emb"], params["w1"], params["b1"],
                           params["w2"], params["b2"])
    V, E = emb.shape
    din, H = w1.shape
    T = block_size
    assert din == T * E
    Hp, Vp = _round_up(H, 128), _round_up(V, 128)

    w1f = jnp.einsum("ve,teh->tvh", emb, w1.reshape(T, E, H))     # (T, V, H) f32
    w1f_p = jnp.zeros((T, V, Hp), jnp.float32).at[:, :, :H].set(w1f)
    b1p = jnp.zeros((1, Hp), jnp.float32).at[:, :H].set(b1)
    w2p = jnp.zeros((Hp, Vp), jnp.float32).at[:H, :V].set(w2)
    b2p = jnp.zeros((1, Vp), jnp.float32).at[:, :V].set(b2)

    mm_dtype = jnp.bfloat16 if use_bf16 else jnp.float32
    return {
        "w1f": w1f_p.astype(mm_dtype), "b1": b1p,
        "w2": w2p.astype(mm_dtype), "b2": b2p,
        "vocab_size": V, "hidden_padded": Hp,
    }


def nextchar_forward(token_ids, prepared, *, training=False, dropout_rng=None,
                     dropout_p=0.2):
    """token_ids: (B, T) int32 in [0, vocab)."""
    B = token_ids.shape[0]
    mask = None
    if training and dropout_p > 0.0:
        # TODO(synk): dropout uses JAX RNG, not torch's RNG stream (inherently
        # framework-specific); statistics match nn.Dropout(p) in train mode.
        keep = jax.random.bernoulli(dropout_rng, 1.0 - dropout_p,
                                    (B, prepared["hidden_padded"]))
        mask = keep.astype(jnp.float32) * (1.0 / (1.0 - dropout_p))
    out_padded = nextchar_mlp(token_ids.astype(jnp.int32),
                              prepared["w1f"], prepared["b1"],
                              prepared["w2"], prepared["b2"], mask)
    # TODO(synk): for very large batches emit (B, vocab) directly instead of the
    # padded (B, 128) + slice, to cut logits HBM writeback 4x.
    return out_padded[:, :prepared["vocab_size"]]


# ----------------------------------- main ------------------------------------
if __name__ == "__main__":
    block_size, vocab_size, emb_dim, hidden_size = 8, 32, 16, 64
    batch = 8

    key = jax.random.PRNGKey(0)
    k_params, k_ids, k_drop = jax.random.split(key, 3)
    params = init_params(k_params, block_size, vocab_size, emb_dim, hidden_size)
    token_ids = jax.random.randint(k_ids, (batch, block_size), 0, vocab_size,
                                   dtype=jnp.int32)

    # Pure-JAX f32 reference of the same forward pass (eval mode).
    x_flat = jnp.take(params["emb"], token_ids, axis=0).reshape(batch, -1)
    h_ref = jnp.maximum(x_flat @ params["w1"] + params["b1"], 0.0)
    ref = h_ref @ params["w2"] + params["b2"]

    # 1) f32 path, eval mode (dropout identity, matches module.eval()).
    prep_f32 = prepare_params(params, block_size, use_bf16=False)
    out = jax.block_until_ready(nextchar_forward(token_ids, prep_f32, training=False))
    assert out.shape == (batch, vocab_size)
    assert jnp.allclose(out, ref, atol=1e-4, rtol=1e-4)

    # 2) bf16-MXU path (v6e/v7x-friendly storage), eval mode, loose tolerance.
    prep_bf16 = prepare_params(params, block_size, use_bf16=True)
    out_bf16 = jax.block_until_ready(nextchar_forward(token_ids, prep_bf16, training=False))
    assert jnp.allclose(out_bf16, ref, atol=1e-1, rtol=1e-1)

    # 3) training mode: dropout mask generated in the wrapper, applied in-kernel.
    out_train = jax.block_until_ready(
        nextchar_forward(token_ids, prep_f32, training=True, dropout_rng=k_drop))
    keep = jax.random.bernoulli(k_drop, 0.8, (batch, prep_f32["hidden_padded"]))
    mask_ref = keep.astype(jnp.float32)[:, :hidden_size] * (1.0 / 0.8)
    ref_train = (h_ref * mask_ref) @ params["w2"] + params["b2"]
    assert out_train.shape == (batch, vocab_size)
    assert jnp.allclose(out_train, ref_train, atol=1e-4, rtol=1e-4)

    print("KERNEL_OK")
</pallas_src>

<mosaic_0001>
module attributes {stable_mosaic.version = 11 : i64} {
  func.func @_nextchar_kernel(%arg0: i32, %arg1: memref<8x8xi32, #tpu.memory_space<vmem>>, %arg2: memref<8x32x128xf32, #tpu.memory_space<vmem>>, %arg3: memref<1x128xf32, #tpu.memory_space<vmem>>, %arg4: memref<128x128xf32, #tpu.memory_space<vmem>>, %arg5: memref<1x128xf32, #tpu.memory_space<vmem>>, %arg6: memref<8x128xf32, #tpu.memory_space<vmem>>) attributes {dimension_semantics = [#tpu.dimension_semantics<parallel>], iteration_bounds = array<i64: 1>, scalar_prefetch = 0 : i64, scratch_operands = 0 : i64, tpu.core_type = #tpu.core_type<tc>, window_params = [{transform_indices = @transform_0, window_bounds = array<i64: 8, 8>}, {pipeline_mode = #tpu.pipeline_mode<synchronous>, transform_indices = @transform_1, window_bounds = array<i64: 8, 32, 128>}, {pipeline_mode = #tpu.pipeline_mode<synchronous>, transform_indices = @transform_2, window_bounds = array<i64: 1, 128>}, {pipeline_mode = #tpu.pipeline_mode<synchronous>, transform_indices = @transform_3, window_bounds = array<i64: 128, 128>}, {pipeline_mode = #tpu.pipeline_mode<synchronous>, transform_indices = @transform_4, window_bounds = array<i64: 1, 128>}, {transform_indices = @transform_5, window_bounds = array<i64: 8, 128>}]} {
    %c0 = arith.constant 0 : index
    %c0_0 = arith.constant 0 : index
    %0 = vector.load %arg1[%c0, %c0_0] : memref<8x8xi32, #tpu.memory_space<vmem>>, vector<8x8xi32>
    %1 = tpu.iota {dimensions = array<i32: 1>} : vector<8x32xi32>
    %cst = arith.constant 0.000000e+00 : f32
    %2 = vector.broadcast %cst : f32 to vector<8x128xf32>
    %3 = vector.extract_strided_slice %0 {offsets = [0, 0], sizes = [8, 1], strides = [1, 1]} : vector<8x8xi32> to vector<8x1xi32>
    %4 = vector.broadcast %3 : vector<8x1xi32> to vector<8x32xi32>
    %5 = arith.cmpi eq, %4, %1 : vector<8x32xi32>
    %6 = arith.extui %5 : vector<8x32xi1> to vector<8x32xi32>
    %7 = arith.sitofp %6 : vector<8x32xi32> to vector<8x32xf32>
    %c0_1 = arith.constant 0 : index
    %c0_2 = arith.constant 0 : index
    %c0_3 = arith.constant 0 : index
    %8 = vector.load %arg2[%c0_1, %c0_2, %c0_3] : memref<8x32x128xf32, #tpu.memory_space<vmem>>, vector<1x32x128xf32>
    %9 = vector.shape_cast %8 : vector<1x32x128xf32> to vector<32x128xf32>
    %cst_4 = arith.constant dense<0.000000e+00> : vector<8x128xf32>
    %10 = tpu.matmul %7, %9, %cst_4 {dimension_numbers = #tpu.dot_dimension_numbers<[1], [0], [0], [1], [0, 0, 1, 1], [], []>} : vector<8x32xf32>, vector<32x128xf32>, vector<8x128xf32> -> vector<8x128xf32>
    %11 = arith.addf %2, %10 : vector<8x128xf32>
    %12 = vector.extract_strided_slice %0 {offsets = [0, 1], sizes = [8, 1], strides = [1, 1]} : vector<8x8xi32> to vector<8x1xi32>
    %13 = vector.broadcast %12 : vector<8x1xi32> to vector<8x32xi32>
    %14 = arith.cmpi eq, %13, %1 : vector<8x32xi32>
    %15 = arith.extui %14 : vector<8x32xi1> to vector<8x32xi32>
    %16 = arith.sitofp %15 : vector<8x32xi32> to vector<8x32xf32>
    %c1 = arith.constant 1 : index
    %c0_5 = arith.constant 0 : index
    %c0_6 = arith.constant 0 : index
    %17 = vector.load %arg2[%c1, %c0_5, %c0_6] : memref<8x32x128xf32, #tpu.memory_space<vmem>>, vector<1x32x128xf32>
    %18 = vector.shape_cast %17 : vector<1x32x128xf32> to vector<32x128xf32>
    %cst_7 = arith.constant dense<0.000000e+00> : vector<8x128xf32>
    %19 = tpu.matmul %16, %18, %cst_7 {dimension_numbers = #tpu.dot_dimension_numbers<[1], [0], [0], [1], [0, 0, 1, 1], [], []>} : vector<8x32xf32>, vector<32x128xf32>, vector<8x128xf32> -> vector<8x128xf32>
    %20 = arith.addf %11, %19 : vector<8x128xf32>
    %21 = vector.extract_strided_slice %0 {offsets = [0, 2], sizes = [8, 1], strides = [1, 1]} : vector<8x8xi32> to vector<8x1xi32>
    %22 = vector.broadcast %21 : vector<8x1xi32> to vector<8x32xi32>
    %23 = arith.cmpi eq, %22, %1 : vector<8x32xi32>
    %24 = arith.extui %23 : vector<8x32xi1> to vector<8x32xi32>
    %25 = arith.sitofp %24 : vector<8x32xi32> to vector<8x32xf32>
    %c2 = arith.constant 2 : index
    %c0_8 = arith.constant 0 : index
    %c0_9 = arith.constant 0 : index
    %26 = vector.load %arg2[%c2, %c0_8, %c0_9] : memref<8x32x128xf32, #tpu.memory_space<vmem>>, vector<1x32x128xf32>
    %27 = vector.shape_cast %26 : vector<1x32x128xf32> to vector<32x128xf32>
    %cst_10 = arith.constant dense<0.000000e+00> : vector<8x128xf32>
    %28 = tpu.matmul %25, %27, %cst_10 {dimension_numbers = #tpu.dot_dimension_numbers<[1], [0], [0], [1], [0, 0, 1, 1], [], []>} : vector<8x32xf32>, vector<32x128xf32>, vector<8x128xf32> -> vector<8x128xf32>
    %29 = arith.addf %20, %28 : vector<8x128xf32>
    %30 = vector.extract_strided_slice %0 {offsets = [0, 3], sizes = [8, 1], strides = [1, 1]} : vector<8x8xi32> to vector<8x1xi32>
    %31 = vector.broadcast %30 : vector<8x1xi32> to vector<8x32xi32>
    %32 = arith.cmpi eq, %31, %1 : vector<8x32xi32>
    %33 = arith.extui %32 : vector<8x32xi1> to vector<8x32xi32>
    %34 = arith.sitofp %33 : vector<8x32xi32> to vector<8x32xf32>
    %c3 = arith.constant 3 : index
    %c0_11 = arith.constant 0 : index
    %c0_12 = arith.constant 0 : index
    %35 = vector.load %arg2[%c3, %c0_11, %c0_12] : memref<8x32x128xf32, #tpu.memory_space<vmem>>, vector<1x32x128xf32>
    %36 = vector.shape_cast %35 : vector<1x32x128xf32> to vector<32x128xf32>
    %cst_13 = arith.constant dense<0.000000e+00> : vector<8x128xf32>
    %37 = tpu.matmul %34, %36, %cst_13 {dimension_numbers = #tpu.dot_dimension_numbers<[1], [0], [0], [1], [0, 0, 1, 1], [], []>} : vector<8x32xf32>, vector<32x128xf32>, vector<8x128xf32> -> vector<8x128xf32>
    %38 = arith.addf %29, %37 : vector<8x128xf32>
    %39 = vector.extract_strided_slice %0 {offsets = [0, 4], sizes = [8, 1], strides = [1, 1]} : vector<8x8xi32> to vector<8x1xi32>
    %40 = vector.broadcast %39 : vector<8x1xi32> to vector<8x32xi32>
    %41 = arith.cmpi eq, %40, %1 : vector<8x32xi32>
    %42 = arith.extui %41 : vector<8x32xi1> to vector<8x32xi32>
    %43 = arith.sitofp %42 : vector<8x32xi32> to vector<8x32xf32>
    %c4 = arith.constant 4 : index
    %c0_14 = arith.constant 0 : index
    %c0_15 = arith.constant 0 : index
    %44 = vector.load %arg2[%c4, %c0_14, %c0_15] : memref<8x32x128xf32, #tpu.memory_space<vmem>>, vector<1x32x128xf32>
    %45 = vector.shape_cast %44 : vector<1x32x128xf32> to vector<32x128xf32>
    %cst_16 = arith.constant dense<0.000000e+00> : vector<8x128xf32>
    %46 = tpu.matmul %43, %45, %cst_16 {dimension_numbers = #tpu.dot_dimension_numbers<[1], [0], [0], [1], [0, 0, 1, 1], [], []>} : vector<8x32xf32>, vector<32x128xf32>, vector<8x128xf32> -> vector<8x128xf32>
    %47 = arith.addf %38, %46 : vector<8x128xf32>
    %48 = vector.extract_strided_slice %0 {offsets = [0, 5], sizes = [8, 1], strides = [1, 1]} : vector<8x8xi32> to vector<8x1xi32>
    %49 = vector.broadcast %48 : vector<8x1xi32> to vector<8x32xi32>
    %50 = arith.cmpi eq, %49, %1 : vector<8x32xi32>
    %51 = arith.extui %50 : vector<8x32xi1> to vector<8x32xi32>
    %52 = arith.sitofp %51 : vector<8x32xi32> to vector<8x32xf32>
    %c5 = arith.constant 5 : index
    %c0_17 = arith.constant 0 : index
    %c0_18 = arith.constant 0 : index
    %53 = vector.load %arg2[%c5, %c0_17, %c0_18] : memref<8x32x128xf32, #tpu.memory_space<vmem>>, vector<1x32x128xf32>
    %54 = vector.shape_cast %53 : vector<1x32x128xf32> to vector<32x128xf32>
    %cst_19 = arith.constant dense<0.000000e+00> : vector<8x128xf32>
    %55 = tpu.matmul %52, %54, %cst_19 {dimension_numbers = #tpu.dot_dimension_numbers<[1], [0], [0], [1], [0, 0, 1, 1], [], []>} : vector<8x32xf32>, vector<32x128xf32>, vector<8x128xf32> -> vector<8x128xf32>
    %56 = arith.addf %47, %55 : vector<8x128xf32>
    %57 = vector.extract_strided_slice %0 {offsets = [0, 6], sizes = [8, 1], strides = [1, 1]} : vector<8x8xi32> to vector<8x1xi32>
    %58 = vector.broadcast %57 : vector<8x1xi32> to vector<8x32xi32>
    %59 = arith.cmpi eq, %58, %1 : vector<8x32xi32>
    %60 = arith.extui %59 : vector<8x32xi1> to vector<8x32xi32>
    %61 = arith.sitofp %60 : vector<8x32xi32> to vector<8x32xf32>
    %c6 = arith.constant 6 : index
    %c0_20 = arith.constant 0 : index
    %c0_21 = arith.constant 0 : index
    %62 = vector.load %arg2[%c6, %c0_20, %c0_21] : memref<8x32x128xf32, #tpu.memory_space<vmem>>, vector<1x32x128xf32>
    %63 = vector.shape_cast %62 : vector<1x32x128xf32> to vector<32x128xf32>
    %cst_22 = arith.constant dense<0.000000e+00> : vector<8x128xf32>
    %64 = tpu.matmul %61, %63, %cst_22 {dimension_numbers = #tpu.dot_dimension_numbers<[1], [0], [0], [1], [0, 0, 1, 1], [], []>} : vector<8x32xf32>, vector<32x128xf32>, vector<8x128xf32> -> vector<8x128xf32>
    %65 = arith.addf %56, %64 : vector<8x128xf32>
    %66 = vector.extract_strided_slice %0 {offsets = [0, 7], sizes = [8, 1], strides = [1, 1]} : vector<8x8xi32> to vector<8x1xi32>
    %67 = vector.broadcast %66 : vector<8x1xi32> to vector<8x32xi32>
    %68 = arith.cmpi eq, %67, %1 : vector<8x32xi32>
    %69 = arith.extui %68 : vector<8x32xi1> to vector<8x32xi32>
    %70 = arith.sitofp %69 : vector<8x32xi32> to vector<8x32xf32>
    %c7 = arith.constant 7 : index
    %c0_23 = arith.constant 0 : index
    %c0_24 = arith.constant 0 : index
    %71 = vector.load %arg2[%c7, %c0_23, %c0_24] : memref<8x32x128xf32, #tpu.memory_space<vmem>>, vector<1x32x128xf32>
    %72 = vector.shape_cast %71 : vector<1x32x128xf32> to vector<32x128xf32>
    %cst_25 = arith.constant dense<0.000000e+00> : vector<8x128xf32>
    %73 = tpu.matmul %70, %72, %cst_25 {dimension_numbers = #tpu.dot_dimension_numbers<[1], [0], [0], [1], [0, 0, 1, 1], [], []>} : vector<8x32xf32>, vector<32x128xf32>, vector<8x128xf32> -> vector<8x128xf32>
    %74 = arith.addf %65, %73 : vector<8x128xf32>
    %c0_26 = arith.constant 0 : index
    %c0_27 = arith.constant 0 : index
    %75 = vector.load %arg3[%c0_26, %c0_27] : memref<1x128xf32, #tpu.memory_space<vmem>>, vector<1x128xf32>
    %76 = vector.broadcast %75 : vector<1x128xf32> to vector<8x128xf32>
    %77 = arith.addf %74, %76 : vector<8x128xf32>
    %cst_28 = arith.constant 0.000000e+00 : f32
    %78 = vector.broadcast %cst_28 : f32 to vector<8x128xf32>
    %79 = arith.maximumf %77, %78 : vector<8x128xf32>
    %c0_29 = arith.constant 0 : index
    %c0_30 = arith.constant 0 : index
    %80 = vector.load %arg4[%c0_29, %c0_30] : memref<128x128xf32, #tpu.memory_space<vmem>>, vector<128x128xf32>
    %cst_31 = arith.constant dense<0.000000e+00> : vector<8x128xf32>
    %81 = tpu.matmul %79, %80, %cst_31 {dimension_numbers = #tpu.dot_dimension_numbers<[1], [0], [0], [1], [0, 0, 1, 1], [], []>} : vector<8x128xf32>, vector<128x128xf32>, vector<8x128xf32> -> vector<8x128xf32>
    %c0_32 = arith.constant 0 : index
    %c0_33 = arith.constant 0 : index
    %82 = vector.load %arg5[%c0_32, %c0_33] : memref<1x128xf32, #tpu.memory_space<vmem>>, vector<1x128xf32>
    %83 = vector.broadcast %82 : vector<1x128xf32> to vector<8x128xf32>
    %84 = arith.addf %81, %83 : vector<8x128xf32>
    %c0_34 = arith.constant 0 : index
    %c0_35 = arith.constant 0 : index
    %85 = vector.load %arg6[%c0_34, %c0_35] : memref<8x128xf32, #tpu.memory_space<vmem>>, vector<8x128xf32>
    tpu.vector_store %arg6[%c0_34, %c0_35], %84 {strides = array<i32>} : memref<8x128xf32, #tpu.memory_space<vmem>>, vector<8x128xf32>,
    return
  }
  func.func @transform_0(%arg0: i32) -> (i32, i32) {
    %c0_i32 = arith.constant 0 : i32
    %c0_i32_0 = arith.constant 0 : i32
    return %arg0, %c0_i32 : i32, i32
  }
  func.func @transform_1(%arg0: i32) -> (i32, i32, i32) {
    %c0_i32 = arith.constant 0 : i32
    %c0_i32_0 = arith.constant 0 : i32
    %c0_i32_1 = arith.constant 0 : i32
    %c0_i32_2 = arith.constant 0 : i32
    return %c0_i32, %c0_i32_0, %c0_i32_1 : i32, i32, i32
  }
  func.func @transform_2(%arg0: i32) -> (i32, i32) {
    %c0_i32 = arith.constant 0 : i32
    %c0_i32_0 = arith.constant 0 : i32
    %c0_i32_1 = arith.constant 0 : i32
    return %c0_i32, %c0_i32_0 : i32, i32
  }
  func.func @transform_3(%arg0: i32) -> (i32, i32) {
    %c0_i32 = arith.constant 0 : i32
    %c0_i32_0 = arith.constant 0 : i32
    %c0_i32_1 = arith.constant 0 : i32
    return %c0_i32, %c0_i32_0 : i32, i32
  }
  func.func @transform_4(%arg0: i32) -> (i32, i32) {
    %c0_i32 = arith.constant 0 : i32
    %c0_i32_0 = arith.constant 0 : i32
    %c0_i32_1 = arith.constant 0 : i32
    return %c0_i32, %c0_i32_0 : i32, i32
  }
  func.func @transform_5(%arg0: i32) -> (i32, i32) {
    %c0_i32 = arith.constant 0 : i32
    %c0_i32_0 = arith.constant 0 : i32
    return %arg0, %c0_i32 : i32, i32
  }
}

</mosaic_0001>

<bundles_post_ra>
// kernel: tpu_custom_call.1
= control target key start
LH: loop header
LB: loop body
LE: loop exit
PB: predicated region body
PF: predicated region fallthrough
CT: control target
= control target key end

     0   :  { %10 = vsyncpa [#allocation3], 0  ;;  %s1425_s0 = inlined_call_operand.hbm [shape: s32[8,8], index: 0, kind: input, shape index: {}]   ;;  %s1426_s1 = inlined_call_operand.hbm [shape: f32[8,32,128], index: 1, kind: input, shape index: {}]   ;;  %s1427_s2 = inlined_call_operand.vmem [shape: f32[1,128], index: 2, kind: input, shape index: {}]   ;;  %s1428_s3 = inlined_call_operand.hbm [shape: f32[128,128], index: 3, kind: input, shape index: {}]   ;;  %s1429_s4 = inlined_call_operand.vmem [shape: f32[1,128], index: 4, kind: input, shape index: {}]   ;;  %s1430_s5 = inlined_call_operand.hbm [shape: f32[8,128], index: 5, kind: output, shape index: {}]  }
   0x1   :  { %11 = vsyncpa [#allocation6], 0 }
   0x2   :  { %12 = vsyncpa [#allocation4], 0  ;;  %s1250_s18 = smov [#allocation5]   ;;  %s1156_s22 = scalar_lea.hbm %s1426_s1, 4096 }
   0x3   :  { %s28_s19 = sshll.u32 %s1250_s18, 4  ;;  %p1157_p0 = scmp.ne.s32.totalorder %s1426_s1, %s1156_s22  ;;  %s29_s19 = int_to_ptr.vmem [resolvable:$true] %s28_s19 }
   0x4   :  { %p1160_p1 = scmp.lt.u32.totalorder %s1156_s22, %s1426_s1 }
   0x6   :  { %p1162_p2 = pnand %p1160_p1, %p1157_p0 }
   0x8   :  { %1165 = shalt.err (!%p1162_p2)
}
   0x9   :  { %s1166_s27 = scalar_lea.vmem %s29_s19, 4096  ;;  %p1171_p4 = scmp.lt.s32.totalorder %s29_s19, %s29_s19 }
   0xa   :  { %p1167_p3 = scmp.ne.s32.totalorder %s29_s19, %s1166_s27  ;;  %p1172_p5 = scmp.lt.s32.totalorder %s1166_s27, %s1166_s27 }
   0xc   :  { %p1173_p6 = por %p1172_p5, %p1171_p4 }
   0xe   :  { %p1174_p7 = pnand %p1173_p6, %p1167_p3 }
  0x10   :  { %1177 = shalt.err (!%p1174_p7)
}
  0x11   :  { %s1251_s28 = smov 128   ;;  %s1252_s29 = smov 8  }
  0x12   :  { %34 = dma.hbm_to_vmem [thread:$0]  %s1426_s1, 4096, %s29_s19, [#allocation6], %s1251_s28, %s1251_s28, %s1252_s29  }
  0x13   :  { %s1253_s7 = smov [#allocation2]   ;;  %s1254_s9 = smov [#allocation7]  }
  0x14   :  { %s19_s8 = sshll.u32 %s1253_s7, 4  ;;  %s42_s10 = sshll.u32 %s1254_s9, 4  ;;  %s20_s8 = int_to_ptr.vmem [resolvable:$true] %s19_s8  ;;  %s43_s10 = int_to_ptr.vmem [resolvable:$true] %s42_s10 }
  0x15   :  { %s1178_s13 = scalar_lea.hbm %s1425_s0, 128 }
  0x16   :  { %p1179_p8 = scmp.ne.s32.totalorder %s1425_s0, %s1178_s13  ;;  %p1182_p9 = scmp.lt.u32.totalorder %s1178_s13, %s1425_s0 }
  0x18   :  { %p1184_p10 = pnand %p1182_p9, %p1179_p8 }
  0x1a   :  { %1187 = shalt.err (!%p1184_p10)
}
  0x1b   :  { %s1188_s1 = scalar_lea.vmem %s20_s8, 128  ;;  %p1193_p12 = scmp.lt.s32.totalorder %s20_s8, %s20_s8 }
  0x1c   :  { %p1189_p11 = scmp.ne.s32.totalorder %s20_s8, %s1188_s1  ;;  %p1194_p13 = scmp.lt.s32.totalorder %s1188_s1, %s1188_s1 }
  0x1e   :  { %p1195_p0 = por %p1194_p13, %p1193_p12 }
  0x20   :  { %p1196_p1 = pnand %p1195_p0, %p1189_p11 }
  0x22   :  { %1199 = shalt.err (!%p1196_p1)
}
  0x23   :  { %22 = dma.hbm_to_vmem [thread:$0]  %s1425_s0, 128, %s20_s8, [#allocation3]  }
  0x24   :  { %s1200_s22 = scalar_lea.hbm %s1428_s3, 2048 }
  0x25   :  { %p1201_p2 = scmp.ne.s32.totalorder %s1428_s3, %s1200_s22  ;;  %p1204_p3 = scmp.lt.u32.totalorder %s1200_s22, %s1428_s3 }
  0x27   :  { %p1206_p4 = pnand %p1204_p3, %p1201_p2 }
  0x29   :  { %1209 = shalt.err (!%p1206_p4)
}
  0x2a   :  { %s1210_s27 = scalar_lea.vmem %s43_s10, 2048  ;;  %p1215_p6 = scmp.lt.s32.totalorder %s43_s10, %s43_s10 }
  0x2b   :  { %p1211_p5 = scmp.ne.s32.totalorder %s43_s10, %s1210_s27  ;;  %p1216_p7 = scmp.lt.s32.totalorder %s1210_s27, %s1210_s27 }
  0x2d   :  { %p1217_p8 = por %p1216_p7, %p1215_p6 }
  0x2f   :  { %p1218_p9 = pnand %p1217_p8, %p1211_p5 }
  0x31   :  { %1221 = shalt.err (!%p1218_p9)
}
  0x32   :  { %48 = dma.hbm_to_vmem [thread:$0]  %s1428_s3, 2048, %s43_s10, [#allocation6], %s1251_s28, %s1251_s28, %s1252_s29  }
  0x33   :  { %1244 = dma.done.wait [#allocation3], 128  }
  0x34   :  { %1245 = vsyncadd [#allocation3], 4294967168 }
  0x35   :  { %1246 = dma.done.wait [#allocation6], 6144  }
  0x36   :  { %1247 = vsyncadd [#allocation6], 4294961152  ;;  %v1255_v0 = vmov 1   ;;  %v1256_v1 = vmov 2   ;;  %v1257_v2 = vmov 0.0|0.0   ;;  %v60_v3 = vld [vmem:[#allocation2] sm:$0xff]  ;;  %v61_v23 = vlaneseq }
  0x37   :  { %1147 = vset.pattern.permute.xlu0 %v1255_v0  ;;  %1149 = vset.pattern.permute.xlu1 %v1256_v1  ;;  %v80_v4 = vld [vmem:[#allocation5 + $0x20] sm:$0xff]  ;;  %v81_v5 = vld [vmem:[#allocation5 + $0x28] sm:$0xff]  ;;  %v82_v7 = vld [vmem:[#allocation5 + $0x30] sm:$0xff]  ;;  %vm1258_vm0 = vmmov 0   ;;  %v1259_v9 = vmov 0.0   ;;  %v1260_v11 = vmov 0  }
  0x38   :  { %1058 = vmatprep.subr.bf16.mxu1 %v1257_v2  ;;  %1082 = vmatprep.subr.bf16.mxu0 %v1257_v2  ;;  %v1059_v6 = vpack.c.bf16 %v81_v5, %v80_v4  ;;  %v83_v8 = vld [vmem:[#allocation5 + $0x38] sm:$0xff]  ;;  %v1261_v12 = vmov 3   ;;  %v1262_v13 = vmov 4   ;;  %v1263_v14 = vmov 5   ;;  %v408_v17 = vld [vmem:[#allocation5 + $0x80] sm:$0xff]  ;;  %v409_v18 = vld [vmem:[#allocation5 + $0x88] sm:$0xff] }
  0x39   :  { %74 = vperm.xlu0 %1147, %v60_v3   ;;  %232 = vperm.xlu1 %1149, %v60_v3   ;;  %v1062_v10 = vpack.c.bf16 %v83_v8, %v82_v7  ;;  %v1264_v15 = vmov 6   ;;  %v1265_v16 = vmov 7   ;;  %v1083_v19 = vpack.c.bf16 %v409_v18, %v408_v17  ;;  %v410_v20 = vld [vmem:[#allocation5 + $0x90] sm:$0xff]  ;;  %v411_v21 = vld [vmem:[#allocation5 + $0x98] sm:$0xff]  ;;  %v69_v25 = vld [vmem:[#allocation5] sm:$0xff]  ;;  %s1266_s7 = smov [#allocation8]  }
  0x3a   :  { %943 = vmatprep.mubr.msk.f32.mxu1 %vm1258_vm0, %v1259_v9  ;;  %987 = vmatprep.mubr.msk.f32.mxu0 %vm1258_vm0, %v1259_v9  ;;  %v1086_v22 = vpack.c.bf16 %v411_v21, %v410_v20  ;;  %v1349_v24 = vand.u32 127, %v61_v23  ;;  %v70_v26 = vld [vmem:[#allocation5 + $0x8] sm:$0xff]  ;;  %vm84_vm1 = vcmask 261120   ;;  %v71_v29 = vld [vmem:[#allocation5 + $0x10] sm:$0xff]  ;;  %v72_v30 = vld [vmem:[#allocation5 + $0x18] sm:$0xff]  ;;  %s850_s8 = sshll.u32 %s1266_s7, 4  ;;  %s851_s8 = int_to_ptr.vmem [resolvable:$true] %s850_s8 }
  0x3b   :  { %1060 = vmatpush3.bf16.msra.mxu1 %v1059_v6  ;;  %1084 = vmatpush3.bf16.msra.mxu0 %v1083_v19  ;;  %v1065_v28 = vpack.c.bf16 %v70_v26, %v69_v25  ;;  %v1068_v33 = vpack.c.bf16 %v72_v30, %v71_v29  ;;  %v238_v35 = vld [vmem:[#allocation5 + $0x40] sm:$0xff]  ;;  %v239_v36 = vld [vmem:[#allocation5 + $0x48] sm:$0xff]  ;;  %v240_v42 = vld [vmem:[#allocation5 + $0x50] sm:$0xff]  ;;  %s1222_s9 = scalar_lea.vmem %s851_s8, 128  ;;  %p1227_p11 = scmp.lt.s32.totalorder %s851_s8, %s851_s8 }
  0x3c   :  { %1061 = vmatprep.subr.bf16.mxu1 %v1257_v2  ;;  %1085 = vmatprep.subr.bf16.mxu0 %v1257_v2  ;;  %v578_v38 = vld [vmem:[#allocation5 + $0xc0] sm:$0xff]  ;;  %v579_v39 = vld [vmem:[#allocation5 + $0xc8] sm:$0xff]  ;;  %v1071_v41 = vpack.c.bf16 %v239_v36, %v238_v35  ;;  %v241_v43 = vld [vmem:[#allocation5 + $0x58] sm:$0xff]  ;;  %p1223_p10 = scmp.ne.s32.totalorder %s851_s8, %s1222_s9  ;;  %p1228_p12 = scmp.lt.s32.totalorder %s1222_s9, %s1222_s9 }
  0x3d   :  { %1148 = vset.pattern.permute.xlu0 %v1260_v11  ;;  %1150 = vset.pattern.permute.xlu1 %v1261_v12  ;;  %v1095_v45 = vpack.c.bf16 %v579_v39, %v578_v38  ;;  %v580_v46 = vld [vmem:[#allocation5 + $0xd0] sm:$0xff]  ;;  %v581_v47 = vld [vmem:[#allocation5 + $0xd8] sm:$0xff]  ;;  %v1074_v48 = vpack.c.bf16 %v241_v43, %v240_v42  ;;  %v323_v50 = vld [vmem:[#allocation5 + $0x60] sm:$0xff] }
  0x3e   :  { %64 = vperm.xlu0 %1148, %v60_v3   ;;  %317 = vperm.xlu1 %1150, %v60_v3   ;;  %v324_v51 = vld [vmem:[#allocation5 + $0x68] sm:$0xff]  ;;  %v1098_v52 = vpack.c.bf16 %v581_v47, %v580_v46  ;;  %v325_v56 = vld [vmem:[#allocation5 + $0x70] sm:$0xff]  ;;  %v326_v57 = vld [vmem:[#allocation5 + $0x78] sm:$0xff]  ;;  %p1229_p13 = por %p1228_p12, %p1227_p11 }
  0x3f   :  { %1063 = vmatpush3.bf16.msra.mxu1 %v1062_v10  ;;  %1087 = vmatpush3.bf16.msra.mxu0 %v1086_v22  ;;  %v1077_v55 = vpack.c.bf16 %v324_v51, %v323_v50  ;;  %v1080_v59 = vpack.c.bf16 %v326_v57, %v325_v56  ;;  %v493_v60 = vld [vmem:[#allocation5 + $0xa0] sm:$0xff]  ;;  %v494_v61 = vld [vmem:[#allocation5 + $0xa8] sm:$0xff]  ;;  %v495_v0 = vld [vmem:[#allocation5 + $0xb0] sm:$0xff] }
  0x40   :  { %1064 = vmatprep.subr.bf16.mxu1 %v1257_v2  ;;  %1094 = vmatprep.subr.bf16.mxu0 %v1257_v2  ;;  %v1089_v63 = vpack.c.bf16 %v494_v61, %v493_v60  ;;  %v496_v1 = vld [vmem:[#allocation5 + $0xb8] sm:$0xff]  ;;  %v663_v5 = vld [vmem:[#allocation5 + $0xe0] sm:$0xff]  ;;  %v664_v6 = vld [vmem:[#allocation5 + $0xe8] sm:$0xff]  ;;  %p1230_p0 = pnand %p1229_p13, %p1223_p10 }
  0x41   :  { %v1092_v4 = vpack.c.bf16 %v496_v1, %v495_v0  ;;  %v1101_v8 = vpack.c.bf16 %v664_v6, %v663_v5  ;;  %v665_v10 = vld [vmem:[#allocation5 + $0xf0] sm:$0xff]  ;;  %v666_v11 = vld [vmem:[#allocation5 + $0xf8] sm:$0xff]  ;;  %v754_v21 = vld [vmem:[#allocation7 + $0x20] sm:$0xff] }
  0x42   :  { %1151 = vset.pattern.permute.xlu1 %v1262_v13  ;;  %1152 = vset.pattern.permute.xlu0 %v1263_v14  ;;  %v1104_v13 = vpack.c.bf16 %v666_v11, %v665_v10  ;;  %v752_v18 = vld [vmem:[#allocation7 + $0x10] sm:$0xff]  ;;  %v753_v19 = vld [vmem:[#allocation7 + $0x18] sm:$0xff]  ;;  %v755_v22 = vld [vmem:[#allocation7 + $0x28] sm:$0xff] }
  0x43   :  { %402 = vperm.xlu1 %1151, %v60_v3   ;;  %487 = vperm.xlu0 %1152, %v60_v3   ;;  %v1110_v20 = vpack.c.bf16 %v753_v19, %v752_v18  ;;  %v1113_v23 = vpack.c.bf16 %v755_v22, %v754_v21  ;;  %v758_v26 = vld [vmem:[#allocation7 + $0x40] sm:$0xff]  ;;  %v760_v29 = vld [vmem:[#allocation7 + $0x50] sm:$0xff]  ;;  %v761_v30 = vld [vmem:[#allocation7 + $0x58] sm:$0xff] }
  0x44   :  { %v764_v35 = vld [vmem:[#allocation7 + $0x70] sm:$0xff]  ;;  %v765_v36 = vld [vmem:[#allocation7 + $0x78] sm:$0xff] }
  0x47   :  { %1153 = vset.pattern.permute.xlu1 %v1264_v15  ;;  %1155 = vset.pattern.permute.xlu0 %v1265_v16  ;;  %v750_v15 = vld [vmem:[#allocation7] sm:$0xff] }
  0x48   :  { %572 = vperm.xlu1 %1153, %v60_v3  }
  0x4c   :  { %1154 = vset.pattern.permute.xlu1 %v1265_v16  ;;  %v751_v16 = vld [vmem:[#allocation7 + $0x8] sm:$0xff] }
  0x4d   :  { %657 = vperm.xlu1 %1154, %v60_v3   ;;  %v1107_v17 = vpack.c.bf16 %v751_v16, %v750_v15 }
  0xb8   :  { %v75_v27 = vpop.permute.xlu0 %74  ;;  %v233_v31 = vpop.permute.xlu1 %232 }
  0xb9   :  { %vm76_vm2 = vcmp.eq.s32.totalorder %v75_v27, %v1349_v24  ;;  %vm234_vm5 = vcmp.eq.s32.totalorder %v233_v31, %v1349_v24  ;;  %v759_v27 = vld [vmem:[#allocation7 + $0x48] sm:$0xff]  ;;  %v1122_v31 = vpack.c.bf16 %v761_v30, %v760_v29 }
  0xba   :  { %v861_v32 = vsel %vm76_vm2, 1.0, %v1259_v9  ;;  %v864_v54 = vsel %vm234_vm5, 1.0, %v1259_v9 }
  0xbb   :  { %944 = vmatmul.mubr.msk.f32.vlgmr.msra.gmra.mrb[0].mxu1 %vm84_vm1, %v861_v32  ;;  %v762_v32 = vld [vmem:[#allocation7 + $0x60] sm:$0xff] }
  0xbc   :  { %1066 = vmatpush3.bf16.msra.mxu1 %v1065_v28  ;;  %954 = vmatprep.mubr.msk.f32.mxu1 %vm1258_vm0, %v1259_v9  ;;  %v1119_v28 = vpack.c.bf16 %v759_v27, %v758_v26 }
  0xbd   :  { %1067 = vmatprep.subr.bf16.mxu1 %v1257_v2  ;;  %v65_v34 = vpop.permute.xlu0 %64  ;;  %v318_v37 = vpop.permute.xlu1 %317 }
  0xbe   :  { %vm66_vm3 = vcmp.eq.s32.totalorder %v65_v34, %v1349_v24  ;;  %vm319_vm7 = vcmp.eq.s32.totalorder %v318_v37, %v1349_v24  ;;  %v1128_v37 = vpack.c.bf16 %v765_v36, %v764_v35 }
  0xbf   :  { %v860_v40 = vsel %vm66_vm3, 1.0, %v1259_v9  ;;  %v866_v62 = vsel %vm319_vm7, 1.0, %v1259_v9 }
  0xc0   :  { %1069 = vmatpush3.bf16.msra.mxu1 %v1068_v33  ;;  %v763_v33 = vld [vmem:[#allocation7 + $0x68] sm:$0xff] }
  0xc1   :  { %1070 = vmatprep.subr.bf16.mxu1 %v1257_v2  ;;  %v1125_v34 = vpack.c.bf16 %v763_v33, %v762_v32 }
  0xc2   :  { %v403_v44 = vpop.permute.xlu1 %402  ;;  %v488_v3 = vpop.permute.xlu0 %487 }
  0xc3   :  { %955 = vmatmul.mubr.msk.f32.vlgmr.msra.gmra.mrb[2].mxu1 %vm84_vm1, %v860_v40  ;;  %vm404_vm4 = vcmp.eq.s32.totalorder %v403_v44, %v1349_v24  ;;  %vm489_vm8 = vcmp.eq.s32.totalorder %v488_v3, %v1349_v24 }
  0xc4   :  { %1072 = vmatpush3.bf16.msra.mxu1 %v1071_v41  ;;  %965 = vmatprep.mubr.msk.f32.mxu1 %vm1258_vm0, %v1259_v9  ;;  %v868_v49 = vsel %vm404_vm4, 1.0, %v1259_v9  ;;  %v870_v7 = vsel %vm489_vm8, 1.0, %v1259_v9 }
  0xc5   :  { %1073 = vmatprep.subr.bf16.mxu1 %v1257_v2  ;;  %988 = vmatmul.mubr.msk.f32.vlgmr.msra.gmra.mrb[0].mxu0 %vm84_vm1, %v868_v49 }
  0xc6   :  { %1096 = vmatpush3.bf16.msra.mxu0 %v1095_v45  ;;  %1009 = vmatprep.mubr.msk.f32.mxu0 %vm1258_vm0, %v1259_v9 }
  0xc7   :  { %1097 = vmatprep.subr.bf16.mxu0 %v1257_v2  ;;  %v573_v53 = vpop.permute.xlu1 %572 }
  0xc8   :  { %1075 = vmatpush3.bf16.msra.mxu1 %v1074_v48  ;;  %vm574_vm6 = vcmp.eq.s32.totalorder %v573_v53, %v1349_v24 }
  0xc9   :  { %1076 = vmatprep.subr.bf16.mxu1 %v1257_v2  ;;  %v872_v58 = vsel %vm574_vm6, 1.0, %v1259_v9 }
  0xca   :  { %1099 = vmatpush3.bf16.msra.mxu0 %v1098_v52 }
  0xcb   :  { %966 = vmatmul.mubr.msk.f32.vlgmr.msra.gmra.mrb[4].mxu1 %vm84_vm1, %v864_v54  ;;  %1106 = vmatprep.subr.bf16.mxu0 %v1257_v2 }
  0xcc   :  { %1078 = vmatpush3.bf16.msra.mxu1 %v1077_v55  ;;  %976 = vmatprep.mubr.msk.f32.mxu1 %vm1258_vm0, %v1259_v9  ;;  %v658_v12 = vpop.permute.xlu1 %657 }
  0xcd   :  { %1079 = vmatprep.subr.bf16.mxu1 %v1257_v2  ;;  %1010 = vmatmul.mubr.msk.f32.vlgmr.msra.gmra.mrb[2].mxu0 %vm84_vm1, %v872_v58  ;;  %vm659_vm9 = vcmp.eq.s32.totalorder %v658_v12, %v1349_v24  ;;  %v757_v24 = vld [vmem:[#allocation7 + $0x38] sm:$0xff] }
  0xce   :  { %1055 = vmatprep.mubr.msk.f32.mxu0 %vm1258_vm0, %v1259_v9  ;;  %v874_v14 = vsel %vm659_vm9, 1.0, %v1259_v9  ;;  %1108 = vmatpush3.bf16.msra.mxu0 %v1107_v17  ;;  %v876_v58 = vld [vmem:[%s1427_s2] ss:$0 sm:$0xff] }
  0xcf   :  { %1109 = vmatprep.subr.bf16.mxu0 %v1257_v2 }
  0xd0   :  { %1081 = vmatpush3.bf16.msra.mxu1 %v1080_v59 }
  0xd1   :  { %1088 = vmatprep.subr.bf16.mxu1 %v1257_v2 }
  0xd2   :  { %1111 = vmatpush3.bf16.msra.mxu0 %v1110_v20 }
  0xd3   :  { %977 = vmatmul.mubr.msk.f32.vlgmr.msra.gmra.mrb[6].mxu1 %vm84_vm1, %v866_v62  ;;  %1112 = vmatprep.subr.bf16.mxu0 %v1257_v2 }
  0xd4   :  { %1090 = vmatpush3.bf16.msra.mxu1 %v1089_v63  ;;  %998 = vmatprep.mubr.msk.f32.mxu1 %vm1258_vm0, %v1259_v9  ;;  %v877_v63 = vld [vmem:[%s1429_s4] ss:$0 sm:$0xff] }
  0xd5   :  { %1091 = vmatprep.subr.bf16.mxu1 %v1257_v2 }
  0xd6   :  { %1114 = vmatpush3.bf16.msra.mxu0 %v1113_v23 }
  0xd7   :  { %1115 = vmatprep.subr.bf16.mxu0 %v1257_v2 }
  0xd8   :  { %1093 = vmatpush3.bf16.msra.mxu1 %v1092_v4 }
  0xd9   :  { %1100 = vmatprep.subr.bf16.mxu1 %v1257_v2 }
  0xdb   :  { %999 = vmatmul.mubr.msk.f32.vlgmr.msra.gmra.mrb[8].mxu1 %vm84_vm1, %v870_v7 }
  0xdc   :  { %1102 = vmatpush3.bf16.msra.mxu1 %v1101_v8  ;;  %1020 = vmatprep.mubr.msk.f32.mxu1 %vm1258_vm0, %v1259_v9  ;;  %v756_v9 = vld [vmem:[#allocation7 + $0x30] sm:$0xff] }
  0xdd   :  { %1103 = vmatprep.subr.bf16.mxu1 %v1257_v2  ;;  %v1116_v25 = vpack.c.bf16 %v757_v24, %v756_v9 }
  0xdf   :  { %1117 = vmatpush3.bf16.msra.mxu0 %v1116_v25 }
  0xe0   :  { %1105 = vmatpush3.bf16.msra.mxu1 %v1104_v13  ;;  %1118 = vmatprep.subr.bf16.mxu0 %v1257_v2 }
  0xe3   :  { %1021 = vmatmul.mubr.msk.f32.vlgmr.msra.gmra.mrb[10].mxu1 %vm84_vm1, %v874_v14  ;;  %1120 = vmatpush3.bf16.msra.mxu0 %v1119_v28 }
  0xe4   :  { %1121 = vmatprep.subr.bf16.mxu0 %v1257_v2 }
  0xe7   :  { %1123 = vmatpush3.bf16.msra.mxu0 %v1122_v31 }
  0xe8   :  { %1124 = vmatprep.subr.bf16.mxu0 %v1257_v2 }
  0xeb   :  { %1126 = vmatpush3.bf16.msra.mxu0 %v1125_v34 }
  0xec   :  { %1127 = vmatprep.subr.bf16.mxu0 %v1257_v2 }
  0xef   :  { %1129 = vmatpush3.bf16.msra.mxu0 %v1128_v37 }
 0x18e   :  { %v154_v38 = vpop.f32.mrb[0].mxu1 }
 0x18f   :  { %v945_v39 = vpop.f32.mrb[1].mxu1 }
 0x196   :  { %v227_v40 = vpop.f32.mrb[2].mxu1 }
 0x197   :  { %v228_v41 = vadd.f32 %v227_v40, %v154_v38  ;;  %v956_v42 = vpop.f32.mrb[3].mxu1 }
 0x198   :  { %v481_v43 = vpop.f32.mrb[0].mxu0 }
 0x199   :  { %v989_v44 = vpop.f32.mrb[1].mxu0 }
 0x19e   :  { %v311_v45 = vpop.f32.mrb[4].mxu1 }
 0x19f   :  { %v315_v46 = vadd.f32 %v311_v45, %v228_v41  ;;  %v967_v47 = vpop.f32.mrb[5].mxu1 }
 0x1a0   :  { %v651_v48 = vpop.f32.mrb[2].mxu0 }
 0x1a1   :  { %v1011_v49 = vpop.f32.mrb[3].mxu0 }
 0x1a6   :  { %v396_v50 = vpop.f32.mrb[6].mxu1 }
 0x1a7   :  { %v400_v51 = vadd.f32 %v396_v50, %v315_v46  ;;  %v978_v52 = vpop.f32.mrb[7].mxu1 }
 0x1a9   :  { %v485_v2 = vadd.f32 %v481_v43, %v400_v51 }
 0x1ae   :  { %v566_v53 = vpop.f32.mrb[8].mxu1 }
 0x1af   :  { %v570_v54 = vadd.f32 %v566_v53, %v485_v2  ;;  %v1000_v55 = vpop.f32.mrb[9].mxu1 }
 0x1b1   :  { %v655_v56 = vadd.f32 %v651_v48, %v570_v54 }
 0x1b6   :  { %v736_v57 = vpop.f32.mrb[10].mxu1 }
 0x1b7   :  { %v740_v59 = vadd.f32 %v736_v57, %v655_v56  ;;  %v1022_v60 = vpop.f32.mrb[11].mxu1 }
 0x1b9   :  { %v748_v61 = vadd.f32 %v876_v58, %v740_v59 }
 0x1bb   :  { %v749_v62 = vmax.f32 %v748_v61, 0.0 }
 0x1bd   :  { %1056 = vmatmul.mubr.f32.vlgmr.msra.gmra.mrb[4].mxu0 %v749_v62 }
 0x290   :  { %v839_v0 = vpop.f32.mrb[4].mxu0 }
 0x291   :  { %v840_v1 = vadd.f32 %v877_v63, %v839_v0  ;;  %v1057_v3 = vpop.f32.mrb[5].mxu0 }
 0x293   :  { %843 = vst [vmem:[#allocation8] sm:$0xff] %v840_v1 }
 0x294   :  { %1233 = shalt.err (!%p1230_p0)
}
 0x295   :  { %s1234_s11 = scalar_lea.hbm %s1430_s5, 128 }
 0x296   :  { %p1235_p1 = scmp.ne.s32.totalorder %s1430_s5, %s1234_s11  ;;  %p1238_p2 = scmp.lt.u32.totalorder %s1234_s11, %s1430_s5 }
 0x298   :  { %p1240_p3 = pnand %p1238_p2, %p1235_p1 }
 0x29a   :  { %1243 = shalt.err (!%p1240_p3)
}
 0x29b   :  { %853 = dma.vmem_to_hbm [thread:$0]  %s851_s8, 128, %s1430_s5, [#allocation4]  }
 0x29c   :  { %1248 = dma.done.wait [#allocation4], 128  }
 0x29d   :  { %1249 = vsyncadd [#allocation4], 4294967168 }
 0x29e   :  { %857 = vsyncpa [#allocation3], 1 }
 0x29f   :  { %858 = vsyncpa [#allocation6], 1 }
 0x2a0   :  { %859 = vsyncpa [#allocation4], 1 }

</bundles_post_ra>
